<compile_context>
chip_gen: v7x
topology: tpu7x:2x2x1
jax: 0.10.0
libtpu: 0.0.40
codegen_flags: <defaults>
</compile_context>

<pallas_src>
import functools

import jax
import jax.numpy as jnp
from jax.experimental import pallas as pl
from jax.experimental.pallas import tpu as pltpu

H_PAD = 128  # hidden dim padded to one full lane width (MXU / vreg friendly)
N_PAD = 128  # action dim padded to 128 lanes for the second matmul + softmax math


def policy_net_kernel(x_ref, w1_ref, b1_ref, w2_ref, b2_ref, o_ref, *, num_actions):
    # x_ref:  (TB, in_features)
    # w1_ref: (in_features, H_PAD),  b1_ref: (1, H_PAD)
    # w2_ref: (H_PAD, N_PAD),        b2_ref: (1, N_PAD)
    # o_ref:  (TB, num_actions)  -- unpadded output (16x fewer HBM write bytes)
    x = x_ref[...]

    # linear1 + ReLU (padded hidden lanes are exactly zero: zero W cols + zero bias)
    h = jnp.dot(x, w1_ref[...], preferred_element_type=jnp.float32)
    h = h + b1_ref[...].astype(jnp.float32)
    h = jnp.maximum(h, 0.0)

    # linear2 at full 128-lane width (padded action lanes get logit == 0)
    logits = jnp.dot(h, w2_ref[...], preferred_element_type=jnp.float32)
    logits = logits + b2_ref[...].astype(jnp.float32)

    # mask padded action lanes so they don't perturb the log-softmax normalizer
    lane = jax.lax.broadcasted_iota(jnp.int32, logits.shape, 1)
    logits = jnp.where(lane < num_actions, logits, jnp.float32(-1e30))

    # numerically-stable log-softmax over the action axis (f32 VPU/EUP math)
    m = jnp.max(logits, axis=-1, keepdims=True)
    z = logits - m
    lse = jnp.log(jnp.sum(jnp.exp(z), axis=-1, keepdims=True))
    logp = z - lse

    # store only the real action columns (lane-masked store, but 16x fewer bytes)
    o_ref[...] = logp[:, :num_actions].astype(o_ref.dtype)


def prepare_params(w1, b1, w2, b2, *, dtype=jnp.bfloat16):
    """One-time padding/cast of parameters into kernel layout (outside hot path).

    w1: (in_features, hidden), b1: (hidden,)
    w2: (hidden, num_actions), b2: (num_actions,)
    dtype: storage dtype for the padded weights (bf16 halves HBM read traffic;
           accumulation / softmax stay f32 inside the kernel).
    """
    in_features, hidden = w1.shape
    num_actions = w2.shape[1]
    w1p = jnp.zeros((in_features, H_PAD), dtype).at[:, :hidden].set(w1.astype(dtype))
    b1p = jnp.zeros((1, H_PAD), dtype).at[0, :hidden].set(b1.astype(dtype))
    w2p = jnp.zeros((H_PAD, N_PAD), dtype).at[:hidden, :num_actions].set(w2.astype(dtype))
    b2p = jnp.zeros((1, N_PAD), dtype).at[0, :num_actions].set(b2.astype(dtype))
    return w1p, b1p, w2p, b2p, num_actions


def policy_network_forward_batched(states, params, *, tb=512, out_dtype=jnp.float32):
    """states: (B, in_features) -> (B, num_actions) log-probs.

    tb: batch tile (multiple of 8). 512 already reaches ~85% of the measured
    HBM-roofline tiling curve; sweep 1024/2048 for very large rollout batches
    (the VMEM-limit logic below covers the v5e scoped-VMEM default).
    """
    w1p, b1p, w2p, b2p, num_actions = params
    B, in_features = states.shape
    assert in_features == w1p.shape[0]
    assert tb % 8 == 0

    # Single full-array block when the batch fits in one tile (no padding, no
    # post-slice); otherwise tiles of `tb` rows with a ragged last block that
    # Pallas masks automatically (grid = cdiv, no jnp.pad HBM pass).
    tb_eff = B if B <= tb else tb
    nsteps = pl.cdiv(B, tb_eff)

    out_itemsize = jnp.dtype(out_dtype).itemsize
    param_bytes = sum(int(p.size) * p.dtype.itemsize for p in (w1p, b1p, w2p, b2p))
    cost = pl.CostEstimate(
        flops=2 * B * in_features * H_PAD + 2 * B * H_PAD * N_PAD + 6 * B * N_PAD,
        transcendentals=B * N_PAD + B,
        bytes_accessed=int(states.size) * states.dtype.itemsize
        + param_bytes
        + B * num_actions * out_itemsize,
    )

    # Only raise the scoped-VMEM limit when a very large tile actually needs it
    # (v5e default scoped VMEM is 16 MiB; v6e/v7x have 32 MiB headroom).
    vmem_est = (
        2 * (tb_eff * in_features * states.dtype.itemsize        # x, double-buffered
             + tb_eff * num_actions * out_itemsize               # out, double-buffered
             + param_bytes)                                      # resident weights
        + 4 * tb_eff * N_PAD * 4                                 # f32 intermediates
    )
    extra = {}
    if vmem_est > 12 * 1024 * 1024:
        extra["vmem_limit_bytes"] = int(min(2 * vmem_est, 64 * 1024 * 1024))

    out = pl.pallas_call(
        functools.partial(policy_net_kernel, num_actions=num_actions),
        out_shape=jax.ShapeDtypeStruct((B, num_actions), out_dtype),
        grid=(nsteps,),
        in_specs=[
            pl.BlockSpec((tb_eff, in_features), lambda i: (i, 0)),
            pl.BlockSpec((in_features, H_PAD), lambda i: (0, 0)),
            pl.BlockSpec((1, H_PAD), lambda i: (0, 0)),
            pl.BlockSpec((H_PAD, N_PAD), lambda i: (0, 0)),
            pl.BlockSpec((1, N_PAD), lambda i: (0, 0)),
        ],
        out_specs=pl.BlockSpec((tb_eff, num_actions), lambda i: (i, 0)),
        compiler_params=pltpu.CompilerParams(
            dimension_semantics=("parallel",), **extra
        ),
        cost_estimate=cost,
    )(states, w1p, b1p, w2p, b2p)

    return out


def policy_network_forward(state, params):
    """Exact analogue of the PyTorch forward: state.view(-1) -> 1-D log-probs."""
    in_features = params[0].shape[0]
    x = state.reshape(1, in_features)
    return policy_network_forward_batched(x, params)[0]


def init_params(key, in_features, hidden_size, num_actions):
    """Deterministic synthetic init (uniform, same bound style as nn.Linear)."""
    k1, k2, k3, k4 = jax.random.split(key, 4)
    bound1 = 1.0 / (in_features ** 0.5)
    bound2 = 1.0 / (hidden_size ** 0.5)
    w1 = jax.random.uniform(k1, (in_features, hidden_size), jnp.float32, -bound1, bound1)
    b1 = jax.random.uniform(k2, (hidden_size,), jnp.float32, -bound1, bound1)
    w2 = jax.random.uniform(k3, (hidden_size, num_actions), jnp.float32, -bound2, bound2)
    b2 = jax.random.uniform(k4, (num_actions,), jnp.float32, -bound2, bound2)
    return w1, b1, w2, b2


if __name__ == "__main__":
    in_features = 16
    hidden_size = 32
    num_actions = 8

    key = jax.random.PRNGKey(0)
    key, sk1, sk2, sk3 = jax.random.split(key, 4)

    w1, b1, w2, b2 = init_params(key, in_features, hidden_size, num_actions)

    # pure-JAX reference of the same math
    def ref_forward(x_flat):
        h = jnp.maximum(x_flat @ w1 + b1, 0.0)
        return jax.nn.log_softmax(h @ w2 + b2, axis=-1)

    # ---- f32-stored parameters: exact-math checks --------------------------
    params_f32 = prepare_params(w1, b1, w2, b2, dtype=jnp.float32)

    # 1) single-state forward, exactly like the PyTorch module (.view(-1), LogSoftmax(dim=0))
    state = jax.random.normal(sk1, (4, 4), jnp.float32)  # (4,4) grid observation
    log_probs = jax.block_until_ready(policy_network_forward(state, params_f32))
    ref = ref_forward(state.reshape(-1))
    assert log_probs.shape == (num_actions,)
    assert jnp.allclose(log_probs, ref, atol=1e-5, rtol=1e-5)

    # 2) small batch: single full-array block, no padding, no post-slice
    B = 6
    states = jax.random.normal(sk2, (B, in_features), jnp.float32)
    batch_log_probs = jax.block_until_ready(
        policy_network_forward_batched(states, params_f32)
    )
    ref_batch = jax.vmap(ref_forward)(states)
    assert batch_log_probs.shape == (B, num_actions)
    assert jnp.allclose(batch_log_probs, ref_batch, atol=1e-5, rtol=1e-5)

    # ---- bf16-stored parameters (bandwidth path), multi-tile grid with a
    # ragged last block (tb=128 here just to exercise the partial-block path) -
    params_bf16 = prepare_params(w1, b1, w2, b2, dtype=jnp.bfloat16)
    B2 = 300
    states2 = jax.random.normal(sk3, (B2, in_features), jnp.float32)
    out2 = jax.block_until_ready(
        policy_network_forward_batched(states2, params_bf16, tb=128)
    )
    ref2 = jax.vmap(ref_forward)(states2)
    assert out2.shape == (B2, num_actions)
    assert jnp.allclose(out2, ref2, atol=3e-2, rtol=3e-2)  # bf16 weight quantization

    print("KERNEL_OK")
</pallas_src>

<mosaic_0001>
module attributes {stable_mosaic.version = 11 : i64} {
  func.func @policy_net_kernel(%arg0: i32, %arg1: memref<1x16xf32, #tpu.memory_space<vmem>>, %arg2: memref<16x128xf32, #tpu.memory_space<vmem>>, %arg3: memref<1x128xf32, #tpu.memory_space<vmem>>, %arg4: memref<128x128xf32, #tpu.memory_space<vmem>>, %arg5: memref<1x128xf32, #tpu.memory_space<vmem>>, %arg6: memref<1x8xf32, #tpu.memory_space<vmem>>) attributes {dimension_semantics = [#tpu.dimension_semantics<parallel>], iteration_bounds = array<i64: 1>, scalar_prefetch = 0 : i64, scratch_operands = 0 : i64, tpu.core_type = #tpu.core_type<tc>, window_params = [{transform_indices = @transform_0, window_bounds = array<i64: 1, 16>}, {pipeline_mode = #tpu.pipeline_mode<synchronous>, transform_indices = @transform_1, window_bounds = array<i64: 16, 128>}, {pipeline_mode = #tpu.pipeline_mode<synchronous>, transform_indices = @transform_2, window_bounds = array<i64: 1, 128>}, {pipeline_mode = #tpu.pipeline_mode<synchronous>, transform_indices = @transform_3, window_bounds = array<i64: 128, 128>}, {pipeline_mode = #tpu.pipeline_mode<synchronous>, transform_indices = @transform_4, window_bounds = array<i64: 1, 128>}, {transform_indices = @transform_5, window_bounds = array<i64: 1, 8>}]} {
    %c0 = arith.constant 0 : index
    %c0_0 = arith.constant 0 : index
    %0 = vector.load %arg1[%c0, %c0_0] : memref<1x16xf32, #tpu.memory_space<vmem>>, vector<1x16xf32>
    %c0_1 = arith.constant 0 : index
    %c0_2 = arith.constant 0 : index
    %1 = vector.load %arg2[%c0_1, %c0_2] : memref<16x128xf32, #tpu.memory_space<vmem>>, vector<16x128xf32>
    %cst = arith.constant dense<0.000000e+00> : vector<1x128xf32>
    %2 = tpu.matmul %0, %1, %cst {dimension_numbers = #tpu.dot_dimension_numbers<[1], [0], [0], [1], [0, 0, 1, 1], [], []>} : vector<1x16xf32>, vector<16x128xf32>, vector<1x128xf32> -> vector<1x128xf32>
    %c0_3 = arith.constant 0 : index
    %c0_4 = arith.constant 0 : index
    %3 = vector.load %arg3[%c0_3, %c0_4] : memref<1x128xf32, #tpu.memory_space<vmem>>, vector<1x128xf32>
    %4 = arith.addf %2, %3 : vector<1x128xf32>
    %cst_5 = arith.constant 0.000000e+00 : f32
    %5 = vector.broadcast %cst_5 : f32 to vector<1x128xf32>
    %6 = arith.maximumf %4, %5 : vector<1x128xf32>
    %c0_6 = arith.constant 0 : index
    %c0_7 = arith.constant 0 : index
    %7 = vector.load %arg4[%c0_6, %c0_7] : memref<128x128xf32, #tpu.memory_space<vmem>>, vector<128x128xf32>
    %cst_8 = arith.constant dense<0.000000e+00> : vector<1x128xf32>
    %8 = tpu.matmul %6, %7, %cst_8 {dimension_numbers = #tpu.dot_dimension_numbers<[1], [0], [0], [1], [0, 0, 1, 1], [], []>} : vector<1x128xf32>, vector<128x128xf32>, vector<1x128xf32> -> vector<1x128xf32>
    %c0_9 = arith.constant 0 : index
    %c0_10 = arith.constant 0 : index
    %9 = vector.load %arg5[%c0_9, %c0_10] : memref<1x128xf32, #tpu.memory_space<vmem>>, vector<1x128xf32>
    %10 = arith.addf %8, %9 : vector<1x128xf32>
    %11 = tpu.iota {dimensions = array<i32: 1>} : vector<1x128xi32>
    %c8_i32 = arith.constant 8 : i32
    %12 = vector.broadcast %c8_i32 : i32 to vector<1x128xi32>
    %13 = arith.cmpi slt, %11, %12 : vector<1x128xi32>
    %cst_11 = arith.constant -1.000000e+30 : f32
    %14 = vector.broadcast %cst_11 : f32 to vector<1x128xf32>
    %15 = arith.select %13, %10, %14 : vector<1x128xi1>, vector<1x128xf32>
    %cst_12 = arith.constant dense<0xFF800000> : vector<1xf32>
    %16 = vector.multi_reduction <maximumf>, %15, %cst_12 [1] : vector<1x128xf32> to vector<1xf32>
    %17 = vector.shape_cast %16 : vector<1xf32> to vector<1x1xf32>
    %18 = vector.broadcast %17 : vector<1x1xf32> to vector<1x128xf32>
    %19 = arith.subf %15, %18 : vector<1x128xf32>
    %20 = math.exp %19 : vector<1x128xf32>
    %cst_13 = arith.constant dense<0.000000e+00> : vector<1xf32>
    %21 = vector.multi_reduction <add>, %20, %cst_13 [1] : vector<1x128xf32> to vector<1xf32>
    %22 = vector.shape_cast %21 : vector<1xf32> to vector<1x1xf32>
    %23 = math.log %22 : vector<1x1xf32>
    %24 = vector.broadcast %23 : vector<1x1xf32> to vector<1x128xf32>
    %25 = arith.subf %19, %24 : vector<1x128xf32>
    %26 = vector.extract_strided_slice %25 {offsets = [0, 0], sizes = [1, 8], strides = [1, 1]} : vector<1x128xf32> to vector<1x8xf32>
    %c0_14 = arith.constant 0 : index
    %c0_15 = arith.constant 0 : index
    %27 = vector.load %arg6[%c0_14, %c0_15] : memref<1x8xf32, #tpu.memory_space<vmem>>, vector<1x8xf32>
    tpu.vector_store %arg6[%c0_14, %c0_15], %26 {strides = array<i32>} : memref<1x8xf32, #tpu.memory_space<vmem>>, vector<1x8xf32>,
    return
  }
  func.func @transform_0(%arg0: i32) -> (i32, i32) {
    %c0_i32 = arith.constant 0 : i32
    %c0_i32_0 = arith.constant 0 : i32
    return %arg0, %c0_i32 : i32, i32
  }
  func.func @transform_1(%arg0: i32) -> (i32, i32) {
    %c0_i32 = arith.constant 0 : i32
    %c0_i32_0 = arith.constant 0 : i32
    %c0_i32_1 = arith.constant 0 : i32
    return %c0_i32, %c0_i32_0 : i32, i32
  }
  func.func @transform_2(%arg0: i32) -> (i32, i32) {
    %c0_i32 = arith.constant 0 : i32
    %c0_i32_0 = arith.constant 0 : i32
    %c0_i32_1 = arith.constant 0 : i32
    return %c0_i32, %c0_i32_0 : i32, i32
  }
  func.func @transform_3(%arg0: i32) -> (i32, i32) {
    %c0_i32 = arith.constant 0 : i32
    %c0_i32_0 = arith.constant 0 : i32
    %c0_i32_1 = arith.constant 0 : i32
    return %c0_i32, %c0_i32_0 : i32, i32
  }
  func.func @transform_4(%arg0: i32) -> (i32, i32) {
    %c0_i32 = arith.constant 0 : i32
    %c0_i32_0 = arith.constant 0 : i32
    %c0_i32_1 = arith.constant 0 : i32
    return %c0_i32, %c0_i32_0 : i32, i32
  }
  func.func @transform_5(%arg0: i32) -> (i32, i32) {
    %c0_i32 = arith.constant 0 : i32
    %c0_i32_0 = arith.constant 0 : i32
    return %arg0, %c0_i32 : i32, i32
  }
}

</mosaic_0001>

<bundles_post_ra>
// kernel: tpu_custom_call.1
= control target key start
LH: loop header
LB: loop body
LE: loop exit
PB: predicated region body
PF: predicated region fallthrough
CT: control target
= control target key end

     0   :  { %10 = vsyncpa [#allocation3], 0  ;;  %s557_s0 = inlined_call_operand.hbm [shape: f32[1,16], index: 0, kind: input, shape index: {}]   ;;  %s558_s1 = inlined_call_operand.hbm [shape: f32[16,128], index: 1, kind: input, shape index: {}]   ;;  %s559_s2 = inlined_call_operand.vmem [shape: f32[1,128], index: 2, kind: input, shape index: {}]   ;;  %s560_s3 = inlined_call_operand.hbm [shape: f32[128,128], index: 3, kind: input, shape index: {}]   ;;  %s561_s4 = inlined_call_operand.vmem [shape: f32[1,128], index: 4, kind: input, shape index: {}]   ;;  %s562_s5 = inlined_call_operand.hbm [shape: f32[1,8], index: 5, kind: output, shape index: {}]  }
   0x1   :  { %11 = vsyncpa [#allocation6], 0 }
   0x2   :  { %12 = vsyncpa [#allocation4], 0  ;;  %s458_s18 = smov [#allocation5]   ;;  %s364_s22 = scalar_lea.hbm %s558_s1, 256 }
   0x3   :  { %s28_s19 = sshll.u32 %s458_s18, 4  ;;  %p365_p0 = scmp.ne.s32.totalorder %s558_s1, %s364_s22  ;;  %s29_s19 = int_to_ptr.vmem [resolvable:$true] %s28_s19 }
   0x4   :  { %p368_p1 = scmp.lt.u32.totalorder %s364_s22, %s558_s1 }
   0x6   :  { %p370_p2 = pnand %p368_p1, %p365_p0 }
   0x8   :  { %373 = shalt.err (!%p370_p2)
}
   0x9   :  { %s374_s27 = scalar_lea.vmem %s29_s19, 256  ;;  %p379_p4 = scmp.lt.s32.totalorder %s29_s19, %s29_s19 }
   0xa   :  { %p375_p3 = scmp.ne.s32.totalorder %s29_s19, %s374_s27  ;;  %p380_p5 = scmp.lt.s32.totalorder %s374_s27, %s374_s27 }
   0xc   :  { %p381_p6 = por %p380_p5, %p379_p4 }
   0xe   :  { %p382_p7 = pnand %p381_p6, %p375_p3 }
  0x10   :  { %385 = shalt.err (!%p382_p7)
}
  0x11   :  { %s459_s28 = smov 128   ;;  %s460_s29 = smov 8  }
  0x12   :  { %34 = dma.hbm_to_vmem [thread:$0]  %s558_s1, 256, %s29_s19, [#allocation6], %s459_s28, %s459_s28, %s460_s29  }
  0x13   :  { %s461_s7 = smov [#allocation2]   ;;  %s462_s9 = smov [#allocation7]  }
  0x14   :  { %s19_s8 = sshll.u32 %s461_s7, 4  ;;  %s42_s10 = sshll.u32 %s462_s9, 4  ;;  %s20_s8 = int_to_ptr.vmem [resolvable:$true] %s19_s8  ;;  %s43_s10 = int_to_ptr.vmem [resolvable:$true] %s42_s10 }
  0x15   :  { %s386_s13 = scalar_lea.hbm %s557_s0, 16 }
  0x16   :  { %p387_p8 = scmp.ne.s32.totalorder %s557_s0, %s386_s13  ;;  %p390_p9 = scmp.lt.u32.totalorder %s386_s13, %s557_s0 }
  0x18   :  { %p392_p10 = pnand %p390_p9, %p387_p8 }
  0x1a   :  { %395 = shalt.err (!%p392_p10)
}
  0x1b   :  { %s396_s1 = scalar_lea.vmem %s20_s8, 16  ;;  %s400_s18 = scalar_lea.vmem %s20_s8, 32 }
  0x1c   :  { %p397_p11 = scmp.ne.s32.totalorder %s20_s8, %s396_s1  ;;  %p401_p12 = scmp.lt.s32.totalorder %s20_s8, %s20_s8 }
  0x1d   :  { %p402_p13 = scmp.lt.s32.totalorder %s400_s18, %s396_s1 }
  0x1f   :  { %p403_p0 = por %p402_p13, %p401_p12 }
  0x21   :  { %p404_p1 = pnand %p403_p0, %p397_p11 }
  0x23   :  { %407 = shalt.err (!%p404_p1)
}
  0x24   :  { %22 = dma.hbm_to_vmem [thread:$0]  %s557_s0, 16, %s20_s8, [#allocation3]  }
  0x25   :  { %s408_s23 = scalar_lea.hbm %s560_s3, 2048 }
  0x26   :  { %p409_p2 = scmp.ne.s32.totalorder %s560_s3, %s408_s23  ;;  %p412_p3 = scmp.lt.u32.totalorder %s408_s23, %s560_s3 }
  0x28   :  { %p414_p4 = pnand %p412_p3, %p409_p2 }
  0x2a   :  { %417 = shalt.err (!%p414_p4)
}
  0x2b   :  { %s418_s30 = scalar_lea.vmem %s43_s10, 2048  ;;  %p423_p6 = scmp.lt.s32.totalorder %s43_s10, %s43_s10 }
  0x2c   :  { %p419_p5 = scmp.ne.s32.totalorder %s43_s10, %s418_s30  ;;  %p424_p7 = scmp.lt.s32.totalorder %s418_s30, %s418_s30 }
  0x2e   :  { %p425_p8 = por %p424_p7, %p423_p6 }
  0x30   :  { %p426_p9 = pnand %p425_p8, %p419_p5 }
  0x32   :  { %429 = shalt.err (!%p426_p9)
}
  0x33   :  { %48 = dma.hbm_to_vmem [thread:$0]  %s560_s3, 2048, %s43_s10, [#allocation6], %s459_s28, %s459_s28, %s460_s29  }
  0x34   :  { %452 = dma.done.wait [#allocation3], 16  }
  0x35   :  { %453 = vsyncadd [#allocation3], 4294967280 }
  0x36   :  { %454 = dma.done.wait [#allocation6], 2304  }
  0x37   :  { %455 = vsyncadd [#allocation6], 4294964992  ;;  %v463_v0 = vmov 0.0|0.0   ;;  %vm464_vm0 = vmmov 0   ;;  %v465_v1 = vmov 0.0   ;;  %v61_v2 = vld [vmem:[#allocation5] sm:$0xff]  ;;  %v226_v35 = vlaneseq }
  0x38   :  { %324 = vmatprep.subr.bf16.mxu0 %v463_v0  ;;  %286 = vmatprep.mubr.msk.f32.mxu0 %vm464_vm0, %v465_v1  ;;  %v62_v3 = vld [vmem:[#allocation5 + $0x8] sm:$0xff]  ;;  %v139_v5 = vld [vmem:[#allocation7] sm:$0xff]  ;;  %v140_v6 = vld [vmem:[#allocation7 + $0x8] sm:$0xff]  ;;  %vm64_vm1 = vcmask 130048   ;;  %vm230_vm3 = vcmask 1040384   ;;  %vm243_vm4 = vcmask 57344  }
  0x39   :  { %327 = vmatprep.subr.bf16.mxu1 %v463_v0  ;;  %321 = vmatprep.mubr.msk.f32.mxu1 %vm464_vm0, %v465_v1  ;;  %v325_v4 = vpack.c.bf16 %v62_v3, %v61_v2  ;;  %v141_v7 = vld [vmem:[#allocation7 + $0x10] sm:$0xff]  ;;  %v328_v8 = vpack.c.bf16 %v140_v6, %v139_v5  ;;  %v142_v9 = vld [vmem:[#allocation7 + $0x18] sm:$0xff]  ;;  %v60_v10 = vld [vmem:[#allocation2] sm:$0x1]  ;;  %v227_v36 = vand.u32 127, %v226_v35 }
  0x3a   :  { %v331_v11 = vpack.c.bf16 %v142_v9, %v141_v7  ;;  %v143_v12 = vld [vmem:[#allocation7 + $0x20] sm:$0xff]  ;;  %v144_v13 = vld [vmem:[#allocation7 + $0x28] sm:$0xff]  ;;  %v145_v15 = vld [vmem:[#allocation7 + $0x30] sm:$0xff] }
  0x3b   :  { %326 = vmatpush3.bf16.msra.mxu0 %v325_v4  ;;  %329 = vmatpush3.bf16.msra.mxu1 %v328_v8  ;;  %v334_v14 = vpack.c.bf16 %v144_v13, %v143_v12  ;;  %v146_v16 = vld [vmem:[#allocation7 + $0x38] sm:$0xff]  ;;  %v147_v18 = vld [vmem:[#allocation7 + $0x40] sm:$0xff]  ;;  %v148_v19 = vld [vmem:[#allocation7 + $0x48] sm:$0xff]  ;;  %vm228_vm2 = vcmp.lt.s32.totalorder %v227_v36, 8 }
  0x3c   :  { %330 = vmatprep.subr.bf16.mxu1 %v463_v0  ;;  %v337_v17 = vpack.c.bf16 %v146_v16, %v145_v15  ;;  %v340_v20 = vpack.c.bf16 %v148_v19, %v147_v18  ;;  %v149_v21 = vld [vmem:[#allocation7 + $0x50] sm:$0xff]  ;;  %v150_v22 = vld [vmem:[#allocation7 + $0x58] sm:$0xff]  ;;  %v151_v24 = vld [vmem:[#allocation7 + $0x60] sm:$0xff] }
  0x3d   :  { %v343_v23 = vpack.c.bf16 %v150_v22, %v149_v21  ;;  %v152_v25 = vld [vmem:[#allocation7 + $0x68] sm:$0xff]  ;;  %v153_v27 = vld [vmem:[#allocation7 + $0x70] sm:$0xff]  ;;  %v154_v28 = vld [vmem:[#allocation7 + $0x78] sm:$0xff] }
  0x3e   :  { %287 = vmatmul.mubr.msk.f32.vlgmr.msra.gmra.mrb[0].mxu0 %vm64_vm1, %v60_v10  ;;  %v346_v26 = vpack.c.bf16 %v152_v25, %v151_v24  ;;  %v349_v29 = vpack.c.bf16 %v154_v28, %v153_v27  ;;  %v63_v30 = vld [vmem:[%s559_s2] sm:$0x1]  ;;  %s466_s2 = smov [#allocation8]  }
  0x3f   :  { %332 = vmatpush3.bf16.msra.mxu1 %v331_v11  ;;  %v155_v37 = vld [vmem:[%s561_s4] sm:$0x1]  ;;  %s251_s4 = sshll.u32 %s466_s2, 4  ;;  %s252_s4 = int_to_ptr.vmem [resolvable:$true] %s251_s4 }
  0x40   :  { %333 = vmatprep.subr.bf16.mxu1 %v463_v0  ;;  %s430_s8 = scalar_lea.vmem %s252_s4, 16  ;;  %s434_s9 = scalar_lea.vmem %s252_s4, 32 }
  0x41   :  { %p431_p10 = scmp.ne.s32.totalorder %s252_s4, %s430_s8  ;;  %p435_p11 = scmp.lt.s32.totalorder %s252_s4, %s252_s4 }
  0x42   :  { %p436_p12 = scmp.lt.s32.totalorder %s434_s9, %s430_s8 }
  0x43   :  { %335 = vmatpush3.bf16.msra.mxu1 %v334_v14 }
  0x44   :  { %336 = vmatprep.subr.bf16.mxu1 %v463_v0  ;;  %p437_p13 = por %p436_p12, %p435_p11 }
  0x46   :  { %p438_p0 = pnand %p437_p13, %p431_p10 }
  0x47   :  { %338 = vmatpush3.bf16.msra.mxu1 %v337_v17 }
  0x48   :  { %339 = vmatprep.subr.bf16.mxu1 %v463_v0 }
  0x4b   :  { %341 = vmatpush3.bf16.msra.mxu1 %v340_v20 }
  0x4c   :  { %342 = vmatprep.subr.bf16.mxu1 %v463_v0 }
  0x4f   :  { %344 = vmatpush3.bf16.msra.mxu1 %v343_v23 }
  0x50   :  { %345 = vmatprep.subr.bf16.mxu1 %v463_v0 }
  0x53   :  { %347 = vmatpush3.bf16.msra.mxu1 %v346_v26 }
  0x54   :  { %348 = vmatprep.subr.bf16.mxu1 %v463_v0 }
  0x57   :  { %350 = vmatpush3.bf16.msra.mxu1 %v349_v29 }
 0x111   :  { %v134_v31 = vpop.f32.mrb[0].mxu0 }
 0x112   :  { %v135_v32 = vadd.f32 %v134_v31, %v63_v30  ;;  %v288_v33 = vpop.f32.mrb[1].mxu0 }
 0x114   :  { %v138_v34 = vmax.f32 %v135_v32, 0.0 }
 0x116   :  { %322 = vmatmul.mubr.f32.vlgmr.msra.gmra.mrb[0].mxu1 %v138_v34 }
 0x1e9   :  { %v222_v38 = vpop.f32.mrb[0].mxu1 }
 0x1ea   :  { %v223_v39 = vadd.f32 %v222_v38, %v155_v37  ;;  %v323_v40 = vpop.f32.mrb[1].mxu1 }
 0x1ec   :  { %v229_v41 = vsel %vm228_vm2, %v223_v39, -1e+30 }
 0x1ed   :  { %v231_v42 = vsel %vm230_vm3, %v229_v41, -inf }
 0x1ee   :  { %232 = vmax.xlane.f32.xlu0 %v231_v42 }
 0x27b   :  { %v233_v43 = vpop.xlane.xlu0 %232 }
 0x27c   :  { %v234_v44 = vsub.f32 %v229_v41, %v233_v43 }
 0x27e   :  { %v235_v45 = vmul.f32 1.442695, %v234_v44 }
 0x280   :  { %360 = vpow2.f32 %v235_v45 }
 0x28a   :  { %v361_v46 = vpop.eup %360 }
 0x28b   :  { %v237_v47 = vsel %vm230_vm3, %v361_v46, 0.0 }
 0x28c   :  { %238 = vadd.xlane.f32.xlu0 %v237_v47 }
 0x319   :  { %v239_v48 = vpop.xlane.xlu0 %238 }
 0x31a   :  { %362 = vlog2.f32 %v239_v48 }
 0x324   :  { %v363_v49 = vpop.eup %362 }
 0x325   :  { %v241_v50 = vmul.f32 0.6931472, %v363_v49 }
 0x327   :  { %v242_v51 = vsub.f32 %v234_v44, %v241_v50 }
 0x329   :  { %244 = vst.msk [vmem:[#allocation8] sm:$0x1] %vm243_vm4, %v242_v51 }
 0x32a   :  { %441 = shalt.err (!%p438_p0)
}
 0x32b   :  { %s442_s12 = scalar_lea.hbm %s562_s5, 16 }
 0x32c   :  { %p443_p1 = scmp.ne.s32.totalorder %s562_s5, %s442_s12  ;;  %p446_p2 = scmp.lt.u32.totalorder %s442_s12, %s562_s5 }
 0x32e   :  { %p448_p3 = pnand %p446_p2, %p443_p1 }
 0x330   :  { %451 = shalt.err (!%p448_p3)
}
 0x331   :  { %254 = dma.vmem_to_hbm [thread:$0]  %s252_s4, 16, %s562_s5, [#allocation4]  }
 0x332   :  { %456 = dma.done.wait [#allocation4], 16  }
 0x333   :  { %457 = vsyncadd [#allocation4], 4294967280 }
 0x334   :  { %258 = vsyncpa [#allocation3], 1 }
 0x335   :  { %259 = vsyncpa [#allocation6], 1 }
 0x336   :  { %260 = vsyncpa [#allocation4], 1 }

</bundles_post_ra>
